<compile_context>
chip_gen: v5e
topology: v5e:2x2
jax: 0.10.0
libtpu: 0.0.40
codegen_flags: <defaults>
</compile_context>

<pallas_src>
import functools

import jax
import jax.numpy as jnp
from jax import lax
from jax.experimental import pallas as pl
from jax.experimental.pallas import tpu as pltpu


def _gaussian_embed_kernel(dist_ref, out_ref, *, coeff, start, step,
                           num_gaussians):
    # dist_ref: (1, TILE_N) VMEM   -- distances on the lane axis
    # out_ref : (G, TILE_N) VMEM   -- gaussians on sublanes, distances on lanes
    # Baked-in linspace centers: offset[g] = start + g * step, as a (G, 1) col.
    g_idx = lax.broadcasted_iota(jnp.int32, (num_gaussians, 1), 0)
    offs = g_idx.astype(jnp.float32) * step + start            # (G, 1)
    d = dist_ref[...] - offs                                   # (G, TILE_N)
    out_ref[...] = jnp.exp(coeff * (d * d)).astype(out_ref.dtype)


def gaussian_embedding(dist, start=0.0, stop=5.0, num_gaussians=50, *,
                       tile_n=16384, out_dtype=jnp.float32, transposed=False,
                       small_n_threshold=2048):
    """Pallas TPU version of GaussianEmbedding.forward.

    Returns exp(coeff * (dist[:, None] - offset[None, :])**2) with
    offset = linspace(start, stop, num_gaussians), shape (dist.size, G)
    (or (G, dist.size) if transposed=True, skipping the wrapper transpose).
    """
    if num_gaussians < 2:
        # step would be 0 -> coeff = -inf (PyTorch module would index-error).
        raise ValueError("num_gaussians must be >= 2")

    step = (stop - start) / (num_gaussians - 1)
    coeff = -0.5 / step ** 2

    dist_flat = dist.reshape(-1).astype(jnp.float32)
    n = dist_flat.shape[0]

    # Small-N fast path: launch + pad/slice overhead dominates below ~2K
    # distances; the XLA-fused broadcast+exp is as fast or faster there.
    if n < small_n_threshold:
        g_idx = jnp.arange(num_gaussians, dtype=jnp.float32)
        offs = g_idx * step + start
        d = dist_flat[:, None] - offs[None, :]
        out = jnp.exp(coeff * d * d).astype(out_dtype)
        return out.T if transposed else out

    # --- tile selection -----------------------------------------------------
    # Lane-dense tiling: tiled axis must be a multiple of 128 (lane width).
    tile_n = max(128, (int(tile_n) // 128) * 128)
    # Cap so double-buffered f32 output stays well inside v7x's 64 MiB VMEM.
    tile_n = min(tile_n, 32768)
    n_lane_blocks = (n + 127) // 128
    n_lane = max(128, n_lane_blocks * 128)
    if n_lane > 128:
        # Aim for >= 2 grid steps so v7x's two TensorCores both get work.
        half = ((n_lane_blocks + 1) // 2) * 128
        tile = max(128, min(tile_n, half))
    else:
        tile = 128
    n_pad = ((n_lane + tile - 1) // tile) * tile
    if n_pad != n:
        dist_flat = jnp.pad(dist_flat, (0, n_pad - n))
    dist_2d = dist_flat.reshape(1, n_pad)

    # --- VMEM budget / cost hint ---------------------------------------------
    out_itemsize = jnp.dtype(out_dtype).itemsize
    dbuf_bytes = 2 * num_gaussians * tile * out_itemsize + 2 * tile * 4
    vmem_limit = int(min(32 * 2**20, max(16 * 2**20, dbuf_bytes + 8 * 2**20)))
    cost = pl.CostEstimate(
        flops=3 * num_gaussians * n_pad,
        transcendentals=num_gaussians * n_pad,
        bytes_accessed=4 * n_pad + num_gaussians * n_pad * out_itemsize,
    )

    kernel = functools.partial(
        _gaussian_embed_kernel,
        coeff=float(coeff), start=float(start), step=float(step),
        num_gaussians=num_gaussians)

    out_t = pl.pallas_call(
        kernel,
        out_shape=jax.ShapeDtypeStruct((num_gaussians, n_pad), out_dtype),
        grid_spec=pltpu.PrefetchScalarGridSpec(
            num_scalar_prefetch=0,
            grid=(n_pad // tile,),
            in_specs=[pl.BlockSpec((1, tile), lambda i: (0, i))],
            out_specs=pl.BlockSpec((num_gaussians, tile), lambda i: (0, i)),
        ),
        compiler_params=pltpu.CompilerParams(
            dimension_semantics=("parallel",),   # shards grid across v7x TCs
            vmem_limit_bytes=vmem_limit,
        ),
        cost_estimate=cost,
    )(dist_2d)

    if transposed:
        return out_t[:, :n]
    # Layout plumbing back to the module's (N, G) convention; consumers that
    # can take (G, N) should pass transposed=True to avoid this HBM round-trip.
    return out_t[:, :n].T


def _reference(dist, start, stop, num_gaussians):
    offset = jnp.linspace(start, stop, num_gaussians, dtype=jnp.float32)
    step = (stop - start) / (num_gaussians - 1)
    coeff = -0.5 / step ** 2
    d = dist.reshape(-1, 1).astype(jnp.float32) - offset.reshape(1, -1)
    return jnp.exp(coeff * d * d)


if __name__ == "__main__":
    key = jax.random.PRNGKey(0)
    start, stop, num_gaussians = 0.0, 5.0, 50

    # Small edge-distance vector (64 edges). Force the Pallas path so the
    # kernel itself is exercised even below the fast-path threshold.
    dist_small = jax.random.uniform(key, (64,), minval=0.0, maxval=5.0,
                                    dtype=jnp.float32)
    out_small = jax.block_until_ready(
        gaussian_embedding(dist_small, start, stop, num_gaussians,
                           small_n_threshold=0))
    ref_small = _reference(dist_small, start, stop, num_gaussians)
    assert out_small.shape == (64, num_gaussians), out_small.shape
    assert jnp.allclose(out_small, ref_small, atol=1e-5, rtol=1e-5), \
        float(jnp.max(jnp.abs(out_small - ref_small)))

    # Small-N fast path (default threshold) should agree too.
    out_small_fast = jax.block_until_ready(
        gaussian_embedding(dist_small, start, stop, num_gaussians))
    assert jnp.allclose(out_small_fast, ref_small, atol=1e-5, rtol=1e-5)

    # Larger, non-multiple N: exercises padding + a multi-step (>=2) grid.
    key2 = jax.random.PRNGKey(0)
    dist_big = jax.random.uniform(key2, (3000,), minval=0.0, maxval=5.0,
                                  dtype=jnp.float32)
    out_big = jax.block_until_ready(
        gaussian_embedding(dist_big, start, stop, num_gaussians))
    ref_big = _reference(dist_big, start, stop, num_gaussians)
    assert out_big.shape == (3000, num_gaussians), out_big.shape
    assert jnp.allclose(out_big, ref_big, atol=1e-5, rtol=1e-5), \
        float(jnp.max(jnp.abs(out_big - ref_big)))

    # Transposed (G, N) hot-path output (no wrapper .T / extra HBM round-trip).
    out_big_t = jax.block_until_ready(
        gaussian_embedding(dist_big, start, stop, num_gaussians,
                           transposed=True))
    assert out_big_t.shape == (num_gaussians, 3000), out_big_t.shape
    assert jnp.allclose(out_big_t, ref_big.T, atol=1e-5, rtol=1e-5)

    print("KERNEL_OK")
</pallas_src>

<mosaic_0001>
module attributes {stable_mosaic.version = 11 : i64} {
  func.func @_gaussian_embed_kernel(%arg0: i32, %arg1: memref<1x128xf32, #tpu.memory_space<vmem>>, %arg2: memref<50x128xf32, #tpu.memory_space<vmem>>) attributes {dimension_semantics = [#tpu.dimension_semantics<parallel>], iteration_bounds = array<i64: 1>, scalar_prefetch = 0 : i64, scratch_operands = 0 : i64, tpu.core_type = #tpu.core_type<tc>, window_params = [{transform_indices = @transform_0, window_bounds = array<i64: 1, 128>}, {transform_indices = @transform_1, window_bounds = array<i64: 50, 128>}]} {
    %0 = tpu.iota {dimensions = array<i32: 0>} : vector<50x1xi32>
    %1 = arith.sitofp %0 : vector<50x1xi32> to vector<50x1xf32>
    %cst = arith.constant 0.10204082 : f32
    %2 = vector.broadcast %cst : f32 to vector<50x1xf32>
    %3 = arith.mulf %1, %2 : vector<50x1xf32>
    %cst_0 = arith.constant 0.000000e+00 : f32
    %4 = vector.broadcast %cst_0 : f32 to vector<50x1xf32>
    %5 = arith.addf %3, %4 : vector<50x1xf32>
    %c0 = arith.constant 0 : index
    %c0_1 = arith.constant 0 : index
    %6 = vector.load %arg1[%c0, %c0_1] : memref<1x128xf32, #tpu.memory_space<vmem>>, vector<1x128xf32>
    %7 = vector.broadcast %6 : vector<1x128xf32> to vector<50x128xf32>
    %8 = vector.broadcast %5 : vector<50x1xf32> to vector<50x128xf32>
    %9 = arith.subf %7, %8 : vector<50x128xf32>
    %10 = arith.mulf %9, %9 : vector<50x128xf32>
    %cst_2 = arith.constant -4.802000e+01 : f32
    %11 = vector.broadcast %cst_2 : f32 to vector<50x128xf32>
    %12 = arith.mulf %11, %10 : vector<50x128xf32>
    %13 = math.exp %12 : vector<50x128xf32>
    %c0_3 = arith.constant 0 : index
    %c0_4 = arith.constant 0 : index
    %14 = vector.load %arg2[%c0_3, %c0_4] : memref<50x128xf32, #tpu.memory_space<vmem>>, vector<50x128xf32>
    tpu.vector_store %arg2[%c0_3, %c0_4], %13 {strides = array<i32>} : memref<50x128xf32, #tpu.memory_space<vmem>>, vector<50x128xf32>,
    return
  }
  func.func @transform_0(%arg0: i32) -> (i32, i32) {
    %c0_i32 = arith.constant 0 : i32
    %c0_i32_0 = arith.constant 0 : i32
    return %c0_i32, %arg0 : i32, i32
  }
  func.func @transform_1(%arg0: i32) -> (i32, i32) {
    %c0_i32 = arith.constant 0 : i32
    %c0_i32_0 = arith.constant 0 : i32
    return %c0_i32, %arg0 : i32, i32
  }
}

</mosaic_0001>

<bundles_post_ra>
// kernel: tpu_custom_call.1
= control target key start
LH: loop header
LB: loop body
LE: loop exit
PB: predicated region body
PF: predicated region fallthrough
CT: control target
= control target key end

     0   :  { %6 = vsyncpa [#allocation3], 0  ;;  %s208_s0 = inlined_call_operand.hbm [shape: f32[1,128], index: 0, kind: input, shape index: {}]   ;;  %s209_s1 = inlined_call_operand.hbm [shape: f32[50,128], index: 1, kind: output, shape index: {}]  }
   0x1   :  { %7 = vsyncpa [#allocation4], 0  ;;  %s13_s8 = sshll.u32 %s208_s0, 4  ;;  %s188_s9 = smov [#allocation2]   ;;  %s14_s8 = int_to_ptr.hbm [resolvable:$true] %s13_s8 }
   0x2   :  { %s15_s10 = sshll.u32 %s188_s9, 4  ;;  %s16_s10 = int_to_ptr.vmem [resolvable:$true] %s15_s10 }
   0x3   :  { %18 = dma.hbm_to_vmem [thread:$0]  %s14_s8, 16, %s16_s10, [#allocation3]  }
   0x4   :  { %184 = dma.done.wait [#allocation3], 16  }
   0x5   :  { %185 = vsyncadd [#allocation3], 4294967280  ;;  %v23_v0 = vlaneseq  ;;  %v121_v13 = vld [vmem:[#allocation2] ss:$0 sm:$0xff]  ;;  %s189_s0 = smov [#allocation5]   ;;  %s104_s14 = sshll.u32 %s209_s1, 4  ;;  %s105_s14 = int_to_ptr.hbm [resolvable:$true] %s104_s14 }
   0x6   :  { %s102_s11 = sshll.u32 %s189_s0, 4  ;;  %s190_s15 = smov 128   ;;  %s103_s11 = int_to_ptr.vmem [resolvable:$true] %s102_s11 }
   0x7   :  { %v24_v1 = vshrl.u32 %v23_v0, 7  ;;  %s191_s16 = smov 8  }
   0x9   :  { %v31_v2 = vcvt.s32.f32 %v24_v1  ;;  %v25_v3 = vadd.s32 8, %v24_v1  ;;  %v26_v4 = vadd.s32 16, %v24_v1  ;;  %v27_v5 = vadd.s32 24, %v24_v1 }
   0xa   :  { %v28_v6 = vadd.s32 32, %v24_v1  ;;  %v29_v7 = vadd.s32 40, %v24_v1  ;;  %v30_v8 = vadd.s32 48, %v24_v1 }
   0xb   :  { %v38_v9 = vmul.f32 0.10204082, %v31_v2  ;;  %v32_v10 = vcvt.s32.f32 %v25_v3  ;;  %v33_v11 = vcvt.s32.f32 %v26_v4  ;;  %v34_v12 = vcvt.s32.f32 %v27_v5 }
   0xc   :  { %v35_v14 = vcvt.s32.f32 %v28_v6  ;;  %v36_v15 = vcvt.s32.f32 %v29_v7  ;;  %v37_v16 = vcvt.s32.f32 %v30_v8 }
   0xd   :  { %v39_v17 = vmul.f32 0.10204082, %v32_v10  ;;  %v40_v18 = vmul.f32 0.10204082, %v33_v11  ;;  %v41_v19 = vmul.f32 0.10204082, %v34_v12  ;;  %v56_v20 = vsub.f32 %v121_v13, %v38_v9 }
   0xe   :  { %v42_v21 = vmul.f32 0.10204082, %v35_v14  ;;  %v43_v22 = vmul.f32 0.10204082, %v36_v15  ;;  %v44_v23 = vmul.f32 0.10204082, %v37_v16 }
   0xf   :  { %v57_v24 = vsub.f32 %v121_v13, %v39_v17  ;;  %v58_v25 = vsub.f32 %v121_v13, %v40_v18  ;;  %v59_v26 = vsub.f32 %v121_v13, %v41_v19  ;;  %v63_v27 = vmul.f32 %v56_v20, %v56_v20 }
  0x10   :  { %v60_v28 = vsub.f32 %v121_v13, %v42_v21  ;;  %v61_v29 = vsub.f32 %v121_v13, %v43_v22  ;;  %v62_v30 = vsub.f32 %v121_v13, %v44_v23 }
  0x11   :  { %v64_v31 = vmul.f32 %v57_v24, %v57_v24  ;;  %v65_v32 = vmul.f32 %v58_v25, %v58_v25  ;;  %v66_v33 = vmul.f32 %v59_v26, %v59_v26  ;;  %v70_v34 = vmul.f32 -48.02, %v63_v27 }
  0x12   :  { %v67_v35 = vmul.f32 %v60_v28, %v60_v28  ;;  %v68_v36 = vmul.f32 %v61_v29, %v61_v29  ;;  %v69_v37 = vmul.f32 %v62_v30, %v62_v30 }
  0x13   :  { %v71_v38 = vmul.f32 -48.02, %v64_v31  ;;  %v72_v39 = vmul.f32 -48.02, %v65_v32  ;;  %v73_v40 = vmul.f32 -48.02, %v66_v33 }
  0x14   :  { %v77_v41 = vmul.f32 1.442695, %v70_v34  ;;  %v74_v42 = vmul.f32 -48.02, %v67_v35  ;;  %v75_v43 = vmul.f32 -48.02, %v68_v36 }
  0x15   :  { %v79_v44 = vmul.f32 1.442695, %v71_v38  ;;  %v81_v45 = vmul.f32 1.442695, %v72_v39  ;;  %v83_v46 = vmul.f32 1.442695, %v73_v40 }
  0x16   :  { %122 = vpow2.f32 %v77_v41  ;;  %v85_v47 = vmul.f32 1.442695, %v74_v42  ;;  %v76_v48 = vmul.f32 -48.02, %v69_v37  ;;  %v87_v49 = vmul.f32 1.442695, %v75_v43 }
  0x17   :  { %124 = vpow2.f32 %v79_v44 }
  0x18   :  { %126 = vpow2.f32 %v81_v45  ;;  %v89_v50 = vmul.f32 1.442695, %v76_v48 }
  0x19   :  { %128 = vpow2.f32 %v83_v46 }
  0x1a   :  { %130 = vpow2.f32 %v85_v47 }
  0x1b   :  { %132 = vpow2.f32 %v87_v49 }
  0x1c   :  { %v123_v51 = vpop.eup %122  ;;  %134 = vpow2.f32 %v89_v50 }
  0x1d   :  { %v125_v52 = vpop.eup %124  ;;  %91 = vst [vmem:[#allocation5] sm:$0xff] %v123_v51 }
  0x1e   :  { %v127_v53 = vpop.eup %126  ;;  %92 = vst [vmem:[#allocation5 + $0x8] sm:$0xff] %v125_v52 }
  0x1f   :  { %v129_v54 = vpop.eup %128  ;;  %93 = vst [vmem:[#allocation5 + $0x10] sm:$0xff] %v127_v53 }
  0x20   :  { %v131_v55 = vpop.eup %130  ;;  %94 = vst [vmem:[#allocation5 + $0x18] sm:$0xff] %v129_v54 }
  0x21   :  { %v133_v56 = vpop.eup %132  ;;  %95 = vst [vmem:[#allocation5 + $0x20] sm:$0xff] %v131_v55 }
  0x22   :  { %v135_v57 = vpop.eup %134  ;;  %96 = vst [vmem:[#allocation5 + $0x28] sm:$0xff] %v133_v56 }
  0x23   :  { %97 = vst [vmem:[#allocation5 + $0x30] sm:$0x3] %v135_v57 }
  0x24   :  { %110 = dma.vmem_to_hbm [thread:$0]  %s103_s11, 896, %s105_s14, [#allocation4], %s190_s15, %s190_s15, %s191_s16  }
  0x25   :  { %186 = dma.done.wait [#allocation4], 896  }
  0x26   :  { %187 = vsyncadd [#allocation4], 4294966400 }
  0x27   :  { %115 = vsyncpa [#allocation3], 1 }
  0x28   :  { %116 = vsyncpa [#allocation4], 1 }

</bundles_post_ra>
